<compile_context>
chip_gen: v6e
topology: v6e:2x2x1
jax: 0.10.0
libtpu: 0.0.40
codegen_flags: <defaults>
</compile_context>

<pallas_src>
import math
from functools import partial

import jax
import jax.numpy as jnp
from jax.experimental import pallas as pl
from jax.experimental.pallas import tpu as pltpu


def _round_up(x, m):
    return ((x + m - 1) // m) * m


def _sublane_multiple(dtype):
    # 8 for 32-bit, 16 for 16-bit (bf16), 32 for 8-bit dtypes.
    bits = jnp.dtype(dtype).itemsize * 8
    return max(8, 256 // bits)


_VMEM_LIMIT = 32 * 1024 * 1024          # safe on v5e/v6e (128 MiB) and v7x (64 MiB)
_BLOCK_BYTES = 2 * 1024 * 1024          # target f32 working-block size


# ----------------------------------------------------------------------------
# channels_last kernel: rows = tokens, lanes = channels, reduce over lanes.
#   x block: (tm, C), weight/bias blocks: (1, C)
# Note: lane-dense unmasked stores require C % 128 == 0; other C still runs
# correctly but uses masked partial stores.
# ----------------------------------------------------------------------------
def _ln_channels_last_kernel(x_ref, w_ref, b_ref, o_ref, *, eps):
    x = x_ref[...].astype(jnp.float32)                     # (tm, C)
    w = w_ref[...].astype(jnp.float32)                     # (1, C)
    b = b_ref[...].astype(jnp.float32)
    mu = jnp.mean(x, axis=-1, keepdims=True)               # (tm, 1)
    xc = x - mu
    var = jnp.mean(xc * xc, axis=-1, keepdims=True)        # biased, like F.layer_norm
    inv = jax.lax.rsqrt(var + eps)                         # EUP
    o_ref[...] = (xc * inv * w + b).astype(o_ref.dtype)


def layer_norm_channels_last(x, weight, bias, eps=1e-6, block_rows=2048,
                             block_bytes=_BLOCK_BYTES):
    *lead, C = x.shape
    M = math.prod(lead) if lead else 1
    x2 = x.reshape(M, C)                                   # free reshape (collapse leading)

    sub = _sublane_multiple(x.dtype)
    # Cap tile by byte budget of the f32 working copy, keep sublane multiple.
    cap = max(sub, (block_bytes // (C * 4)) // sub * sub)
    tm = min(block_rows, cap, _round_up(M, sub))
    # Keep >= 2 grid steps when possible (feeds both TensorCores on v7x).
    if M > sub and pl.cdiv(M, tm) < 2:
        tm = max(sub, _round_up(pl.cdiv(M, 2), sub))
    grid = (pl.cdiv(M, tm),)

    out = pl.pallas_call(
        partial(_ln_channels_last_kernel, eps=eps),
        out_shape=jax.ShapeDtypeStruct((M, C), x.dtype),
        grid=grid,
        in_specs=[
            pl.BlockSpec((tm, C), lambda i: (i, 0)),
            pl.BlockSpec((1, C), lambda i: (0, 0)),
            pl.BlockSpec((1, C), lambda i: (0, 0)),
        ],
        out_specs=pl.BlockSpec((tm, C), lambda i: (i, 0)),
        compiler_params=pltpu.CompilerParams(
            dimension_semantics=("parallel",),
            vmem_limit_bytes=_VMEM_LIMIT),
    )(x2, weight.reshape(1, C), bias.reshape(1, C))

    return out.reshape(*lead, C)


# ----------------------------------------------------------------------------
# channels_first kernel: keep native (B, C, H*W) layout, batch tb images per block.
#   Sublanes = channels (reduction axis, cross-sublane reduce),
#   lanes    = spatial positions (each lane is an independent norm group).
#   x block: (tb, C, tl), weight/bias blocks: (1, C, 1)
# ----------------------------------------------------------------------------
def _ln_channels_first_kernel(x_ref, w_ref, b_ref, o_ref, *, eps):
    x = x_ref[...].astype(jnp.float32)                     # (tb, C, tl)
    w = w_ref[...].astype(jnp.float32)                     # (1, C, 1)
    b = b_ref[...].astype(jnp.float32)
    mu = jnp.mean(x, axis=1, keepdims=True)                # (tb, 1, tl)
    xc = x - mu
    var = jnp.mean(xc * xc, axis=1, keepdims=True)         # biased (matches .pow(2).mean(1))
    inv = jax.lax.rsqrt(var + eps)                         # EUP
    o_ref[...] = (xc * inv * w + b).astype(o_ref.dtype)


def layer_norm_channels_first(x, weight, bias, eps=1e-6, block_lanes=2048,
                              block_bytes=_BLOCK_BYTES):
    B, C, H, W = x.shape
    L = H * W
    x3 = x.reshape(B, C, L)                                # free reshape

    # Lane tile: full L when it fits the budget (no masked lanes even if
    # L % 128 != 0); otherwise the largest 128-multiple within the budget.
    per_lane_bytes = C * 4                                 # f32 working copy dominates
    max_tl = max(128, (block_bytes // per_lane_bytes) // 128 * 128)
    if L <= max_tl:
        tl = L
    else:
        tl = min(block_lanes, max_tl)
    # Batch tile: fill the remaining byte budget with whole images.
    tb = max(1, min(B, block_bytes // (C * tl * 4)))
    # Keep >= 2 total grid steps for v7x's two TensorCores when possible.
    if pl.cdiv(L, tl) == 1 and B > 1 and pl.cdiv(B, tb) < 2:
        tb = pl.cdiv(B, 2)
    grid = (pl.cdiv(B, tb), pl.cdiv(L, tl))

    out = pl.pallas_call(
        partial(_ln_channels_first_kernel, eps=eps),
        out_shape=jax.ShapeDtypeStruct((B, C, L), x.dtype),
        grid=grid,
        in_specs=[
            pl.BlockSpec((tb, C, tl), lambda bi, li: (bi, 0, li)),
            pl.BlockSpec((1, C, 1), lambda bi, li: (0, 0, 0)),
            pl.BlockSpec((1, C, 1), lambda bi, li: (0, 0, 0)),
        ],
        out_specs=pl.BlockSpec((tb, C, tl), lambda bi, li: (bi, 0, li)),
        compiler_params=pltpu.CompilerParams(
            dimension_semantics=("parallel", "parallel"),
            vmem_limit_bytes=_VMEM_LIMIT),
    )(x3, weight.reshape(1, C, 1), bias.reshape(1, C, 1))

    return out.reshape(B, C, H, W)


def layer_norm(x, weight, bias, eps=1e-6, data_format="channels_last"):
    if data_format == "channels_last":
        return layer_norm_channels_last(x, weight, bias, eps)
    elif data_format == "channels_first":
        return layer_norm_channels_first(x, weight, bias, eps)
    raise NotImplementedError(data_format)


# ----------------------------------------------------------------------------
# Pure-JAX references
# ----------------------------------------------------------------------------
def ref_channels_last(x, w, b, eps):
    mu = jnp.mean(x, axis=-1, keepdims=True)
    var = jnp.mean((x - mu) ** 2, axis=-1, keepdims=True)
    return (x - mu) / jnp.sqrt(var + eps) * w + b


def ref_channels_first(x, w, b, eps):
    mu = jnp.mean(x, axis=1, keepdims=True)
    var = jnp.mean((x - mu) ** 2, axis=1, keepdims=True)
    xn = (x - mu) / jnp.sqrt(var + eps)
    return w[None, :, None, None] * xn + b[None, :, None, None]


if __name__ == "__main__":
    eps = 1e-6
    key = jax.random.PRNGKey(0)
    k1, k2, k3, k4, k5, k6 = jax.random.split(key, 6)

    # channels_last: (B, H, W, C)  -- small test shape; rows not a tile multiple
    # and C not a multiple of 128 to exercise boundary handling.
    B, H, W, C = 2, 16, 16, 32
    x_cl = jax.random.normal(k1, (B, H, W, C), dtype=jnp.float32)
    w_cl = 1.0 + 0.1 * jax.random.normal(k2, (C,), dtype=jnp.float32)
    b_cl = 0.1 * jax.random.normal(k3, (C,), dtype=jnp.float32)

    out_cl = layer_norm(x_cl, w_cl, b_cl, eps, "channels_last")
    out_cl = jax.block_until_ready(out_cl)
    ref_cl = ref_channels_last(x_cl, w_cl, b_cl, eps)
    assert out_cl.shape == x_cl.shape
    assert jnp.allclose(out_cl, ref_cl, atol=1e-4, rtol=1e-4), "channels_last mismatch"

    # channels_first: (B, C, H, W) with a small channel count on sublanes.
    B2, C2, H2, W2 = 2, 4, 16, 16
    x_cf = jax.random.normal(k4, (B2, C2, H2, W2), dtype=jnp.float32)
    w_cf = 1.0 + 0.1 * jax.random.normal(k5, (C2,), dtype=jnp.float32)
    b_cf = 0.1 * jax.random.normal(k6, (C2,), dtype=jnp.float32)

    out_cf = layer_norm(x_cf, w_cf, b_cf, eps, "channels_first")
    out_cf = jax.block_until_ready(out_cf)
    ref_cf = ref_channels_first(x_cf, w_cf, b_cf, eps)
    assert out_cf.shape == x_cf.shape
    assert jnp.allclose(out_cf, ref_cf, atol=1e-4, rtol=1e-4), "channels_first mismatch"

    print("KERNEL_OK")
</pallas_src>

<mosaic_0001>
module attributes {stable_mosaic.version = 11 : i64} {
  func.func @_ln_channels_last_kernel(%arg0: i32, %arg1: memref<256x32xf32, #tpu.memory_space<vmem>>, %arg2: memref<1x32xf32, #tpu.memory_space<vmem>>, %arg3: memref<1x32xf32, #tpu.memory_space<vmem>>, %arg4: memref<256x32xf32, #tpu.memory_space<vmem>>) attributes {dimension_semantics = [#tpu.dimension_semantics<parallel>], iteration_bounds = array<i64: 2>, scalar_prefetch = 0 : i64, scratch_operands = 0 : i64, tpu.core_type = #tpu.core_type<tc>, window_params = [{transform_indices = @transform_0, window_bounds = array<i64: 256, 32>}, {pipeline_mode = #tpu.pipeline_mode<synchronous>, transform_indices = @transform_1, window_bounds = array<i64: 1, 32>}, {pipeline_mode = #tpu.pipeline_mode<synchronous>, transform_indices = @transform_2, window_bounds = array<i64: 1, 32>}, {transform_indices = @transform_3, window_bounds = array<i64: 256, 32>}]} {
    %c0 = arith.constant 0 : index
    %c0_0 = arith.constant 0 : index
    %0 = vector.load %arg1[%c0, %c0_0] : memref<256x32xf32, #tpu.memory_space<vmem>>, vector<256x32xf32>
    %c0_1 = arith.constant 0 : index
    %c0_2 = arith.constant 0 : index
    %1 = vector.load %arg2[%c0_1, %c0_2] : memref<1x32xf32, #tpu.memory_space<vmem>>, vector<1x32xf32>
    %c0_3 = arith.constant 0 : index
    %c0_4 = arith.constant 0 : index
    %2 = vector.load %arg3[%c0_3, %c0_4] : memref<1x32xf32, #tpu.memory_space<vmem>>, vector<1x32xf32>
    %cst = arith.constant dense<0.000000e+00> : vector<256xf32>
    %3 = vector.multi_reduction <add>, %0, %cst [1] : vector<256x32xf32> to vector<256xf32>
    %4 = vector.shape_cast %3 : vector<256xf32> to vector<256x1xf32>
    %cst_5 = arith.constant 3.200000e+01 : f32
    %5 = vector.broadcast %cst_5 : f32 to vector<256x1xf32>
    %6 = arith.divf %4, %5 : vector<256x1xf32>
    %7 = vector.broadcast %6 : vector<256x1xf32> to vector<256x32xf32>
    %8 = arith.subf %0, %7 : vector<256x32xf32>
    %9 = arith.mulf %8, %8 : vector<256x32xf32>
    %cst_6 = arith.constant dense<0.000000e+00> : vector<256xf32>
    %10 = vector.multi_reduction <add>, %9, %cst_6 [1] : vector<256x32xf32> to vector<256xf32>
    %11 = vector.shape_cast %10 : vector<256xf32> to vector<256x1xf32>
    %cst_7 = arith.constant 3.200000e+01 : f32
    %12 = vector.broadcast %cst_7 : f32 to vector<256x1xf32>
    %13 = arith.divf %11, %12 : vector<256x1xf32>
    %cst_8 = arith.constant 9.99999997E-7 : f32
    %14 = vector.broadcast %cst_8 : f32 to vector<256x1xf32>
    %15 = arith.addf %13, %14 : vector<256x1xf32>
    %16 = math.rsqrt %15 : vector<256x1xf32>
    %17 = vector.broadcast %16 : vector<256x1xf32> to vector<256x32xf32>
    %18 = arith.mulf %8, %17 : vector<256x32xf32>
    %19 = vector.broadcast %1 : vector<1x32xf32> to vector<256x32xf32>
    %20 = arith.mulf %18, %19 : vector<256x32xf32>
    %21 = vector.broadcast %2 : vector<1x32xf32> to vector<256x32xf32>
    %22 = arith.addf %20, %21 : vector<256x32xf32>
    %c0_9 = arith.constant 0 : index
    %c0_10 = arith.constant 0 : index
    %23 = vector.load %arg4[%c0_9, %c0_10] : memref<256x32xf32, #tpu.memory_space<vmem>>, vector<256x32xf32>
    tpu.vector_store %arg4[%c0_9, %c0_10], %22 {strides = array<i32>} : memref<256x32xf32, #tpu.memory_space<vmem>>, vector<256x32xf32>,
    return
  }
  func.func @transform_0(%arg0: i32) -> (i32, i32) {
    %c0_i32 = arith.constant 0 : i32
    %c0_i32_0 = arith.constant 0 : i32
    return %arg0, %c0_i32 : i32, i32
  }
  func.func @transform_1(%arg0: i32) -> (i32, i32) {
    %c0_i32 = arith.constant 0 : i32
    %c0_i32_0 = arith.constant 0 : i32
    %c0_i32_1 = arith.constant 0 : i32
    return %c0_i32, %c0_i32_0 : i32, i32
  }
  func.func @transform_2(%arg0: i32) -> (i32, i32) {
    %c0_i32 = arith.constant 0 : i32
    %c0_i32_0 = arith.constant 0 : i32
    %c0_i32_1 = arith.constant 0 : i32
    return %c0_i32, %c0_i32_0 : i32, i32
  }
  func.func @transform_3(%arg0: i32) -> (i32, i32) {
    %c0_i32 = arith.constant 0 : i32
    %c0_i32_0 = arith.constant 0 : i32
    return %arg0, %c0_i32 : i32, i32
  }
}

</mosaic_0001>

<bundles_post_ra>
// kernel: tpu_custom_call.1
= control target key start
LH: loop header
LB: loop body
LE: loop exit
PB: predicated region body
PF: predicated region fallthrough
CT: control target
= control target key end

     0   :  { %s903_s12 = smov 0   ;;  %s1453_s0 = inlined_call_operand.vmem [shape: f32[512,32], index: 0, kind: input, shape index: {}]   ;;  %s1454_s1 = inlined_call_operand.vmem [shape: f32[1,32], index: 1, kind: input, shape index: {}]   ;;  %s1455_s2 = inlined_call_operand.vmem [shape: f32[1,32], index: 2, kind: input, shape index: {}]   ;;  %s1456_s3 = inlined_call_operand.vmem [shape: f32[512,32], index: 3, kind: output, shape index: {}]  }
   0x1 LB: > { %s790_s13 = sadd.s32 4294967295, %s881_s12   ;;  %p794_p0 = scmp.ge.s32.totalorder %s881_s12, 1  ;;  %s881_s12 = sphi %s903_s12, %s13_s12  }
   0x2   : > { %p138_p1 = scmp.lt.s32.totalorder %s881_s12, 3 }
   0x4   : > { %p139_p2 = pnand %p794_p0, %p138_p1 }
   0x5   : > { %s795_s14 = sshll.u32 (!%p139_p2), %s790_s13, 5 }
   0x6   : > { %142 = sbr.rel (%p139_p2) target bundleno = 388 (0x184), region = 32  ;;  %p163_p3 = scmp.lt.s32.totalorder (!%p139_p2), %s795_s14, 63 }
   0xb   : > { %s1458_s14 = smov (!%p163_p3, %s795_s14), 63  ;;  %vm208_vm0 = vcmask 261120  }
   0xc   : > { %s796_s15 = sshll.u32 %s1458_s14, 3 }
   0xd   : > { %s919_s18 = scalar_lea.vmem %s1453_s0, %s796_s15  ;;  %s1290_s25 = scalar_lea.vmem %s1456_s3, %s796_s15 }
   0xe   : > { %v922_v0 = vld [vmem:[%s919_s18] sm:$0xff]  ;;  %v925_v1 = vld [vmem:[%s919_s18 + $0x10] sm:$0xff]  ;;  %v928_v2 = vld [vmem:[%s919_s18 + $0x8] sm:$0xff] }
   0xf   : > { %v209_v3 = vsel %vm208_vm0, %v922_v0, 0.0  ;;  %v215_v4 = vsel %vm208_vm0, %v925_v1, 0.0  ;;  %v935_v5 = vld [vmem:[%s919_s18 + $0x18] sm:$0xff]  ;;  %v212_v6 = vsel %vm208_vm0, %v928_v2, 0.0  ;;  %v942_v8 = vld [vmem:[%s919_s18 + $0x20] sm:$0xff]  ;;  %v945_v9 = vld [vmem:[%s919_s18 + $0x28] sm:$0xff] }
  0x10   : > { %210 = vadd.xlane.f32.xlu0 %v209_v3  ;;  %216 = vadd.xlane.f32.xlu1 %v215_v4  ;;  %v218_v7 = vsel %vm208_vm0, %v935_v5, 0.0  ;;  %v221_v10 = vsel %vm208_vm0, %v942_v8, 0.0  ;;  %v224_v11 = vsel %vm208_vm0, %v945_v9, 0.0  ;;  %v952_v12 = vld [vmem:[%s919_s18 + $0x30] sm:$0xff]  ;;  %v955_v13 = vld [vmem:[%s919_s18 + $0x38] sm:$0xff]  ;;  %v962_v16 = vld [vmem:[%s919_s18 + $0x40] sm:$0xff] }
  0x11   : > { %v227_v14 = vsel %vm208_vm0, %v952_v12, 0.0  ;;  %v230_v15 = vsel %vm208_vm0, %v955_v13, 0.0  ;;  %v965_v17 = vld [vmem:[%s919_s18 + $0x48] sm:$0xff]  ;;  %v233_v18 = vsel %vm208_vm0, %v962_v16, 0.0  ;;  %v972_v20 = vld [vmem:[%s919_s18 + $0x50] sm:$0xff]  ;;  %v975_v21 = vld [vmem:[%s919_s18 + $0x58] sm:$0xff] }
  0x12   : > { %v236_v19 = vsel %vm208_vm0, %v965_v17, 0.0  ;;  %v239_v22 = vsel %vm208_vm0, %v972_v20, 0.0  ;;  %v242_v23 = vsel %vm208_vm0, %v975_v21, 0.0  ;;  %v982_v24 = vld [vmem:[%s919_s18 + $0x60] sm:$0xff]  ;;  %v985_v25 = vld [vmem:[%s919_s18 + $0x68] sm:$0xff]  ;;  %v992_v28 = vld [vmem:[%s919_s18 + $0x70] sm:$0xff] }
  0x13   : > { %v245_v26 = vsel %vm208_vm0, %v982_v24, 0.0  ;;  %v248_v27 = vsel %vm208_vm0, %v985_v25, 0.0  ;;  %v995_v29 = vld [vmem:[%s919_s18 + $0x78] sm:$0xff]  ;;  %v251_v30 = vsel %vm208_vm0, %v992_v28, 0.0  ;;  %v1002_v32 = vld [vmem:[%s919_s18 + $0x80] sm:$0xff]  ;;  %v1005_v33 = vld [vmem:[%s919_s18 + $0x88] sm:$0xff] }
  0x14   : > { %213 = vadd.xlane.f32.xlu0 %v212_v6  ;;  %219 = vadd.xlane.f32.xlu1 %v218_v7  ;;  %v254_v31 = vsel %vm208_vm0, %v995_v29, 0.0  ;;  %v257_v34 = vsel %vm208_vm0, %v1002_v32, 0.0  ;;  %v260_v35 = vsel %vm208_vm0, %v1005_v33, 0.0  ;;  %v1012_v36 = vld [vmem:[%s919_s18 + $0x90] sm:$0xff]  ;;  %v1015_v37 = vld [vmem:[%s919_s18 + $0x98] sm:$0xff]  ;;  %v1022_v40 = vld [vmem:[%s919_s18 + $0xa0] sm:$0xff] }
  0x15   : > { %v263_v38 = vsel %vm208_vm0, %v1012_v36, 0.0  ;;  %v266_v39 = vsel %vm208_vm0, %v1015_v37, 0.0  ;;  %v1025_v41 = vld [vmem:[%s919_s18 + $0xa8] sm:$0xff]  ;;  %v269_v42 = vsel %vm208_vm0, %v1022_v40, 0.0  ;;  %v1032_v44 = vld [vmem:[%s919_s18 + $0xb0] sm:$0xff]  ;;  %v1035_v45 = vld [vmem:[%s919_s18 + $0xb8] sm:$0xff] }
  0x16   : > { %v272_v43 = vsel %vm208_vm0, %v1025_v41, 0.0  ;;  %v275_v46 = vsel %vm208_vm0, %v1032_v44, 0.0  ;;  %v278_v47 = vsel %vm208_vm0, %v1035_v45, 0.0  ;;  %v1042_v48 = vld [vmem:[%s919_s18 + $0xc0] sm:$0xff]  ;;  %v1045_v49 = vld [vmem:[%s919_s18 + $0xc8] sm:$0xff]  ;;  %v1052_v52 = vld [vmem:[%s919_s18 + $0xd0] sm:$0xff] }
  0x17   : > { %v281_v50 = vsel %vm208_vm0, %v1042_v48, 0.0  ;;  %v284_v51 = vsel %vm208_vm0, %v1045_v49, 0.0  ;;  %v1055_v53 = vld [vmem:[%s919_s18 + $0xd8] sm:$0xff]  ;;  %v287_v54 = vsel %vm208_vm0, %v1052_v52, 0.0  ;;  %v1062_v56 = vld [vmem:[%s919_s18 + $0xe0] sm:$0xff]  ;;  %v1065_v57 = vld [vmem:[%s919_s18 + $0xe8] sm:$0xff] }
  0x18   : > { %222 = vadd.xlane.f32.xlu0 %v221_v10  ;;  %225 = vadd.xlane.f32.xlu1 %v224_v11  ;;  %v290_v55 = vsel %vm208_vm0, %v1055_v53, 0.0  ;;  %v293_v58 = vsel %vm208_vm0, %v1062_v56, 0.0  ;;  %v296_v59 = vsel %vm208_vm0, %v1065_v57, 0.0  ;;  %v1072_v60 = vld [vmem:[%s919_s18 + $0xf0] sm:$0xff]  ;;  %v1075_v61 = vld [vmem:[%s919_s18 + $0xf8] sm:$0xff] }
  0x19   : > { %v299_v62 = vsel %vm208_vm0, %v1072_v60, 0.0  ;;  %v302_v63 = vsel %vm208_vm0, %v1075_v61, 0.0 }
  0x1c   : > { %228 = vadd.xlane.f32.xlu0 %v227_v14  ;;  %231 = vadd.xlane.f32.xlu1 %v230_v15 }
  0x20   : > { %234 = vadd.xlane.f32.xlu0 %v233_v18  ;;  %237 = vadd.xlane.f32.xlu1 %v236_v19 }
  0x24   : > { %240 = vadd.xlane.f32.xlu0 %v239_v22  ;;  %243 = vadd.xlane.f32.xlu1 %v242_v23 }
  0x28   : > { %246 = vadd.xlane.f32.xlu0 %v245_v26  ;;  %249 = vadd.xlane.f32.xlu1 %v248_v27 }
  0x2c   : > { %252 = vadd.xlane.f32.xlu0 %v251_v30  ;;  %255 = vadd.xlane.f32.xlu1 %v254_v31 }
  0x30   : > { %258 = vadd.xlane.f32.xlu0 %v257_v34  ;;  %261 = vadd.xlane.f32.xlu1 %v260_v35 }
  0x34   : > { %264 = vadd.xlane.f32.xlu0 %v263_v38  ;;  %267 = vadd.xlane.f32.xlu1 %v266_v39 }
  0x38   : > { %270 = vadd.xlane.f32.xlu0 %v269_v42  ;;  %273 = vadd.xlane.f32.xlu1 %v272_v43 }
  0x3c   : > { %276 = vadd.xlane.f32.xlu0 %v275_v46  ;;  %279 = vadd.xlane.f32.xlu1 %v278_v47 }
  0x40   : > { %282 = vadd.xlane.f32.xlu0 %v281_v50  ;;  %285 = vadd.xlane.f32.xlu1 %v284_v51 }
  0x44   : > { %288 = vadd.xlane.f32.xlu0 %v287_v54  ;;  %291 = vadd.xlane.f32.xlu1 %v290_v55 }
  0x48   : > { %294 = vadd.xlane.f32.xlu0 %v293_v58  ;;  %297 = vadd.xlane.f32.xlu1 %v296_v59 }
  0x4c   : > { %300 = vadd.xlane.f32.xlu0 %v299_v62  ;;  %303 = vadd.xlane.f32.xlu1 %v302_v63 }
  0x99   : > { %v211_v3 = vpop.xlane.xlu0 %210  ;;  %v217_v4 = vpop.xlane.xlu1 %216 }
  0x9a   : > { %v306_v6 = vmul.f32 0.03125, %v211_v3  ;;  %v308_v7 = vmul.f32 0.03125, %v217_v4 }
  0x9c   : > { %v1082_v10 = vsub.f32 %v922_v0, %v306_v6  ;;  %v1085_v11 = vsub.f32 %v925_v1, %v308_v7 }
  0x9d   : > { %v214_v14 = vpop.xlane.xlu0 %213  ;;  %v220_v15 = vpop.xlane.xlu1 %219 }
  0x9e   : > { %v307_v18 = vmul.f32 0.03125, %v214_v14  ;;  %v309_v19 = vmul.f32 0.03125, %v220_v15  ;;  %v370_v22 = vmul.f32 %v1082_v10, %v1082_v10  ;;  %v372_v23 = vmul.f32 %v1085_v11, %v1085_v11 }
  0xa0   : > { %v1092_v26 = vsub.f32 %v928_v2, %v307_v18  ;;  %v1095_v27 = vsub.f32 %v935_v5, %v309_v19  ;;  %v402_v0 = vsel %vm208_vm0, %v370_v22, 0.0  ;;  %v408_v31 = vsel %vm208_vm0, %v372_v23, 0.0 }
  0xa1   : > { %403 = vadd.xlane.f32.xlu0 %v402_v0  ;;  %v223_v1 = vpop.xlane.xlu0 %222  ;;  %v226_v30 = vpop.xlane.xlu1 %225 }
  0xa2   : > { %v310_v34 = vmul.f32 0.03125, %v223_v1  ;;  %v311_v35 = vmul.f32 0.03125, %v226_v30  ;;  %v371_v38 = vmul.f32 %v1092_v26, %v1092_v26  ;;  %v373_v39 = vmul.f32 %v1095_v27, %v1095_v27 }
  0xa4   : > { %v1104_v2 = vsub.f32 %v942_v8, %v310_v34  ;;  %v1107_v5 = vsub.f32 %v945_v9, %v311_v35  ;;  %v405_v42 = vsel %vm208_vm0, %v371_v38, 0.0  ;;  %v411_v47 = vsel %vm208_vm0, %v373_v39, 0.0 }
  0xa5   : > { %409 = vadd.xlane.f32.xlu0 %v408_v31  ;;  %406 = vadd.xlane.f32.xlu1 %v405_v42  ;;  %v229_v43 = vpop.xlane.xlu0 %228  ;;  %v232_v46 = vpop.xlane.xlu1 %231 }
  0xa6   : > { %v312_v50 = vmul.f32 0.03125, %v229_v43  ;;  %v313_v51 = vmul.f32 0.03125, %v232_v46  ;;  %v374_v54 = vmul.f32 %v1104_v2, %v1104_v2  ;;  %v375_v8 = vmul.f32 %v1107_v5, %v1107_v5 }
  0xa8   : > { %v1116_v55 = vsub.f32 %v952_v12, %v312_v50  ;;  %v1119_v9 = vsub.f32 %v955_v13, %v313_v51  ;;  %v414_v58 = vsel %vm208_vm0, %v374_v54, 0.0  ;;  %v417_v63 = vsel %vm208_vm0, %v375_v8, 0.0 }
  0xa9   : > { %412 = vadd.xlane.f32.xlu1 %v411_v47  ;;  %415 = vadd.xlane.f32.xlu0 %v414_v58  ;;  %v235_v59 = vpop.xlane.xlu0 %234  ;;  %v238_v62 = vpop.xlane.xlu1 %237 }
  0xaa   : > { %v314_v3 = vmul.f32 0.03125, %v235_v59  ;;  %v315_v4 = vmul.f32 0.03125, %v238_v62  ;;  %v376_v6 = vmul.f32 %v1116_v55, %v1116_v55  ;;  %v377_v12 = vmul.f32 %v1119_v9, %v1119_v9 }
  0xac   : > { %v1128_v7 = vsub.f32 %v962_v16, %v314_v3  ;;  %v1131_v13 = vsub.f32 %v965_v17, %v315_v4  ;;  %v420_v14 = vsel %vm208_vm0, %v376_v6, 0.0  ;;  %v423_v19 = vsel %vm208_vm0, %v377_v12, 0.0 }
  0xad   : > { %418 = vadd.xlane.f32.xlu1 %v417_v63  ;;  %421 = vadd.xlane.f32.xlu0 %v420_v14  ;;  %v241_v15 = vpop.xlane.xlu0 %240  ;;  %v244_v18 = vpop.xlane.xlu1 %243 }
  0xae   : > { %v316_v22 = vmul.f32 0.03125, %v241_v15  ;;  %v317_v23 = vmul.f32 0.03125, %v244_v18  ;;  %v378_v0 = vmul.f32 %v1128_v7, %v1128_v7  ;;  %v379_v16 = vmul.f32 %v1131_v13, %v1131_v13 }
  0xb0   : > { %v1140_v1 = vsub.f32 %v972_v20, %v316_v22  ;;  %v1143_v17 = vsub.f32 %v975_v21, %v317_v23  ;;  %v426_v30 = vsel %vm208_vm0, %v378_v0, 0.0  ;;  %v429_v35 = vsel %vm208_vm0, %v379_v16, 0.0 }
  0xb1   : > { %424 = vadd.xlane.f32.xlu1 %v423_v19  ;;  %427 = vadd.xlane.f32.xlu0 %v426_v30  ;;  %v247_v31 = vpop.xlane.xlu0 %246  ;;  %v250_v34 = vpop.xlane.xlu1 %249 }
  0xb2   : > { %v318_v38 = vmul.f32 0.03125, %v247_v31  ;;  %v319_v39 = vmul.f32 0.03125, %v250_v34  ;;  %v380_v42 = vmul.f32 %v1140_v1, %v1140_v1  ;;  %v381_v20 = vmul.f32 %v1143_v17, %v1143_v17 }
  0xb4   : > { %v1152_v43 = vsub.f32 %v982_v24, %v318_v38  ;;  %v1155_v21 = vsub.f32 %v985_v25, %v319_v39  ;;  %v432_v46 = vsel %vm208_vm0, %v380_v42, 0.0  ;;  %v435_v51 = vsel %vm208_vm0, %v381_v20, 0.0 }
  0xb5   : > { %430 = vadd.xlane.f32.xlu1 %v429_v35  ;;  %433 = vadd.xlane.f32.xlu0 %v432_v46  ;;  %v253_v47 = vpop.xlane.xlu0 %252  ;;  %v256_v50 = vpop.xlane.xlu1 %255 }
  0xb6   : > { %v320_v54 = vmul.f32 0.03125, %v253_v47  ;;  %v321_v8 = vmul.f32 0.03125, %v256_v50  ;;  %v382_v58 = vmul.f32 %v1152_v43, %v1152_v43  ;;  %v383_v24 = vmul.f32 %v1155_v21, %v1155_v21 }
  0xb8   : > { %v1164_v59 = vsub.f32 %v992_v28, %v320_v54  ;;  %v1167_v25 = vsub.f32 %v995_v29, %v321_v8  ;;  %v438_v62 = vsel %vm208_vm0, %v382_v58, 0.0  ;;  %v441_v4 = vsel %vm208_vm0, %v383_v24, 0.0 }
  0xb9   : > { %436 = vadd.xlane.f32.xlu1 %v435_v51  ;;  %439 = vadd.xlane.f32.xlu0 %v438_v62  ;;  %v259_v63 = vpop.xlane.xlu0 %258  ;;  %v262_v3 = vpop.xlane.xlu1 %261 }
  0xba   : > { %v322_v6 = vmul.f32 0.03125, %v259_v63  ;;  %v323_v12 = vmul.f32 0.03125, %v262_v3  ;;  %v384_v14 = vmul.f32 %v1164_v59, %v1164_v59  ;;  %v385_v28 = vmul.f32 %v1167_v25, %v1167_v25 }
  0xbc   : > { %v1176_v15 = vsub.f32 %v1002_v32, %v322_v6  ;;  %v1179_v29 = vsub.f32 %v1005_v33, %v323_v12  ;;  %v444_v18 = vsel %vm208_vm0, %v384_v14, 0.0  ;;  %v447_v23 = vsel %vm208_vm0, %v385_v28, 0.0 }
  0xbd   : > { %442 = vadd.xlane.f32.xlu1 %v441_v4  ;;  %445 = vadd.xlane.f32.xlu0 %v444_v18  ;;  %v265_v19 = vpop.xlane.xlu0 %264  ;;  %v268_v22 = vpop.xlane.xlu1 %267 }
  0xbe   : > { %v324_v0 = vmul.f32 0.03125, %v265_v19  ;;  %v325_v16 = vmul.f32 0.03125, %v268_v22  ;;  %v386_v30 = vmul.f32 %v1176_v15, %v1176_v15  ;;  %v387_v32 = vmul.f32 %v1179_v29, %v1179_v29 }
  0xc0   : > { %v1188_v31 = vsub.f32 %v1012_v36, %v324_v0  ;;  %v1191_v33 = vsub.f32 %v1015_v37, %v325_v16  ;;  %v450_v34 = vsel %vm208_vm0, %v386_v30, 0.0  ;;  %v453_v39 = vsel %vm208_vm0, %v387_v32, 0.0 }
  0xc1   : > { %448 = vadd.xlane.f32.xlu1 %v447_v23  ;;  %451 = vadd.xlane.f32.xlu0 %v450_v34  ;;  %v271_v35 = vpop.xlane.xlu0 %270  ;;  %v274_v38 = vpop.xlane.xlu1 %273 }
  0xc2   : > { %v326_v42 = vmul.f32 0.03125, %v271_v35  ;;  %v327_v20 = vmul.f32 0.03125, %v274_v38  ;;  %v388_v46 = vmul.f32 %v1188_v31, %v1188_v31  ;;  %v389_v36 = vmul.f32 %v1191_v33, %v1191_v33 }
  0xc4   : > { %v1200_v47 = vsub.f32 %v1022_v40, %v326_v42  ;;  %v1203_v37 = vsub.f32 %v1025_v41, %v327_v20  ;;  %v456_v50 = vsel %vm208_vm0, %v388_v46, 0.0  ;;  %v459_v8 = vsel %vm208_vm0, %v389_v36, 0.0 }
  0xc5   : > { %454 = vadd.xlane.f32.xlu1 %v453_v39  ;;  %457 = vadd.xlane.f32.xlu0 %v456_v50  ;;  %v277_v51 = vpop.xlane.xlu0 %276  ;;  %v280_v54 = vpop.xlane.xlu1 %279 }
  0xc6   : > { %v328_v58 = vmul.f32 0.03125, %v277_v51  ;;  %v329_v24 = vmul.f32 0.03125, %v280_v54  ;;  %v390_v62 = vmul.f32 %v1200_v47, %v1200_v47  ;;  %v391_v40 = vmul.f32 %v1203_v37, %v1203_v37 }
  0xc8   : > { %v1212_v63 = vsub.f32 %v1032_v44, %v328_v58  ;;  %v1215_v41 = vsub.f32 %v1035_v45, %v329_v24  ;;  %v462_v3 = vsel %vm208_vm0, %v390_v62, 0.0  ;;  %v465_v12 = vsel %vm208_vm0, %v391_v40, 0.0 }
  0xc9   : > { %460 = vadd.xlane.f32.xlu1 %v459_v8  ;;  %463 = vadd.xlane.f32.xlu0 %v462_v3  ;;  %v283_v4 = vpop.xlane.xlu0 %282  ;;  %v286_v6 = vpop.xlane.xlu1 %285 }
  0xca   : > { %v330_v14 = vmul.f32 0.03125, %v283_v4  ;;  %v331_v28 = vmul.f32 0.03125, %v286_v6  ;;  %v392_v18 = vmul.f32 %v1212_v63, %v1212_v63  ;;  %v393_v44 = vmul.f32 %v1215_v41, %v1215_v41 }
  0xcc   : > { %v1224_v19 = vsub.f32 %v1042_v48, %v330_v14  ;;  %v1227_v45 = vsub.f32 %v1045_v49, %v331_v28  ;;  %v468_v22 = vsel %vm208_vm0, %v392_v18, 0.0  ;;  %v471_v16 = vsel %vm208_vm0, %v393_v44, 0.0 }
  0xcd   : > { %466 = vadd.xlane.f32.xlu1 %v465_v12  ;;  %469 = vadd.xlane.f32.xlu0 %v468_v22  ;;  %v289_v23 = vpop.xlane.xlu0 %288  ;;  %v292_v0 = vpop.xlane.xlu1 %291 }
  0xce   : > { %v332_v30 = vmul.f32 0.03125, %v289_v23  ;;  %v333_v32 = vmul.f32 0.03125, %v292_v0  ;;  %v394_v34 = vmul.f32 %v1224_v19, %v1224_v19  ;;  %v395_v48 = vmul.f32 %v1227_v45, %v1227_v45 }
  0xd0   : > { %v1236_v35 = vsub.f32 %v1052_v52, %v332_v30  ;;  %v1239_v49 = vsub.f32 %v1055_v53, %v333_v32  ;;  %v474_v38 = vsel %vm208_vm0, %v394_v34, 0.0  ;;  %v477_v20 = vsel %vm208_vm0, %v395_v48, 0.0 }
  0xd1   : > { %472 = vadd.xlane.f32.xlu1 %v471_v16  ;;  %475 = vadd.xlane.f32.xlu0 %v474_v38  ;;  %v295_v39 = vpop.xlane.xlu0 %294  ;;  %v298_v42 = vpop.xlane.xlu1 %297 }
  0xd2   : > { %v334_v46 = vmul.f32 0.03125, %v295_v39  ;;  %v335_v36 = vmul.f32 0.03125, %v298_v42  ;;  %v396_v50 = vmul.f32 %v1236_v35, %v1236_v35  ;;  %v397_v52 = vmul.f32 %v1239_v49, %v1239_v49 }
  0xd4   : > { %v1248_v51 = vsub.f32 %v1062_v56, %v334_v46  ;;  %v1251_v53 = vsub.f32 %v1065_v57, %v335_v36  ;;  %v480_v54 = vsel %vm208_vm0, %v396_v50, 0.0  ;;  %v483_v24 = vsel %vm208_vm0, %v397_v52, 0.0 }
  0xd5   : > { %478 = vadd.xlane.f32.xlu1 %v477_v20  ;;  %481 = vadd.xlane.f32.xlu0 %v480_v54  ;;  %v301_v8 = vpop.xlane.xlu0 %300  ;;  %v304_v58 = vpop.xlane.xlu1 %303 }
  0xd6   : > { %v336_v62 = vmul.f32 0.03125, %v301_v8  ;;  %v337_v40 = vmul.f32 0.03125, %v304_v58  ;;  %v398_v3 = vmul.f32 %v1248_v51, %v1248_v51  ;;  %v399_v56 = vmul.f32 %v1251_v53, %v1251_v53 }
  0xd8   : > { %v1260_v4 = vsub.f32 %v1072_v60, %v336_v62  ;;  %v1263_v57 = vsub.f32 %v1075_v61, %v337_v40  ;;  %v486_v6 = vsel %vm208_vm0, %v398_v3, 0.0  ;;  %v489_v12 = vsel %vm208_vm0, %v399_v56, 0.0 }
  0xd9   : > { %484 = vadd.xlane.f32.xlu1 %v483_v24  ;;  %487 = vadd.xlane.f32.xlu0 %v486_v6  ;;  %v1276_v6 = vld [vmem:[%s1454_s1] ss:$0 sm:$0xff] }
  0xda   : > { %v400_v14 = vmul.f32 %v1260_v4, %v1260_v4  ;;  %v401_v28 = vmul.f32 %v1263_v57, %v1263_v57 }
  0xdc   : > { %v492_v18 = vsel %vm208_vm0, %v400_v14, 0.0  ;;  %v495_v60 = vsel %vm208_vm0, %v401_v28, 0.0 }
  0xdd   : > { %490 = vadd.xlane.f32.xlu1 %v489_v12  ;;  %493 = vadd.xlane.f32.xlu0 %v492_v18  ;;  %v1282_v18 = vld [vmem:[%s1455_s2] ss:$0 sm:$0xff] }
  0xe1   : > { %496 = vadd.xlane.f32.xlu1 %v495_v60 }
 0x12a   : > { %v404_v61 = vpop.xlane.xlu0 %403 }
 0x12b   : > { %v498_v44 = vmul.f32 0.03125, %v404_v61 }
 0x12d   : > { %v530_v22 = vadd.f32 1e-06, %v498_v44 }
 0x12e   : > { %v407_v23 = vpop.xlane.xlu1 %406  ;;  %v410_v0 = vpop.xlane.xlu0 %409 }
 0x12f   : > { %811 = vrsqrt.f32 %v530_v22  ;;  %v499_v16 = vmul.f32 0.03125, %v407_v23  ;;  %v500_v30 = vmul.f32 0.03125, %v410_v0 }
 0x131   : > { %v531_v32 = vadd.f32 1e-06, %v499_v16  ;;  %v532_v34 = vadd.f32 1e-06, %v500_v30 }
 0x132   : > { %v413_v48 = vpop.xlane.xlu1 %412  ;;  %v416_v38 = vpop.xlane.xlu0 %415 }
 0x133   : > { %813 = vrsqrt.f32 %v531_v32  ;;  %v501_v39 = vmul.f32 0.03125, %v413_v48  ;;  %v502_v42 = vmul.f32 0.03125, %v416_v38 }
 0x134   : > { %815 = vrsqrt.f32 %v532_v34 }
 0x135   : > { %v533_v20 = vadd.f32 1e-06, %v501_v39  ;;  %v534_v46 = vadd.f32 1e-06, %v502_v42 }
 0x136   : > { %v419_v36 = vpop.xlane.xlu1 %418  ;;  %v422_v50 = vpop.xlane.xlu0 %421 }
 0x137   : > { %817 = vrsqrt.f32 %v533_v20  ;;  %v503_v52 = vmul.f32 0.03125, %v419_v36  ;;  %v504_v54 = vmul.f32 0.03125, %v422_v50 }
 0x138   : > { %819 = vrsqrt.f32 %v534_v46 }
 0x139   : > { %v535_v8 = vadd.f32 1e-06, %v503_v52  ;;  %v536_v58 = vadd.f32 1e-06, %v504_v54 }
 0x13a   : > { %v425_v24 = vpop.xlane.xlu1 %424  ;;  %v428_v62 = vpop.xlane.xlu0 %427 }
 0x13b   : > { %821 = vrsqrt.f32 %v535_v8  ;;  %v505_v40 = vmul.f32 0.03125, %v425_v24  ;;  %v506_v3 = vmul.f32 0.03125, %v428_v62 }
 0x13c   : > { %v812_v56 = vpop.eup %811  ;;  %823 = vrsqrt.f32 %v536_v58 }
 0x13d   : > { %v594_v12 = vmul.f32 %v812_v56, %v1082_v10  ;;  %v537_v14 = vadd.f32 1e-06, %v505_v40  ;;  %v538_v28 = vadd.f32 1e-06, %v506_v3 }
 0x13e   : > { %v431_v60 = vpop.xlane.xlu1 %430  ;;  %v434_v61 = vpop.xlane.xlu0 %433 }
 0x13f   : > { %v632_v44 = vmul.f32 %v1276_v6, %v594_v12  ;;  %825 = vrsqrt.f32 %v537_v14  ;;  %v507_v22 = vmul.f32 0.03125, %v431_v60  ;;  %v508_v23 = vmul.f32 0.03125, %v434_v61 }
 0x140   : > { %v814_v0 = vpop.eup %813  ;;  %827 = vrsqrt.f32 %v538_v28 }
 0x141   : > { %v816_v10 = vpop.eup %815  ;;  %v670_v16 = vadd.f32 %v1282_v18, %v632_v44  ;;  %v595_v30 = vmul.f32 %v814_v0, %v1092_v26  ;;  %v539_v32 = vadd.f32 1e-06, %v507_v22  ;;  %v540_v34 = vadd.f32 1e-06, %v508_v23 }
 0x142   : > { %v596_v48 = vmul.f32 %v816_v10, %v1085_v11  ;;  %v437_v38 = vpop.xlane.xlu1 %436  ;;  %v440_v39 = vpop.xlane.xlu0 %439 }
 0x143   : > { %702 = vst.msk [vmem:[%s1290_s25] sm:$0xff] %vm208_vm0, %v670_v16  ;;  %v633_v42 = vmul.f32 %v1276_v6, %v595_v30  ;;  %829 = vrsqrt.f32 %v539_v32  ;;  %v509_v20 = vmul.f32 0.03125, %v437_v38  ;;  %v510_v46 = vmul.f32 0.03125, %v440_v39 }
 0x144   : > { %v818_v36 = vpop.eup %817  ;;  %v634_v50 = vmul.f32 %v1276_v6, %v596_v48  ;;  %831 = vrsqrt.f32 %v540_v34 }
 0x145   : > { %v820_v26 = vpop.eup %819  ;;  %v671_v52 = vadd.f32 %v1282_v18, %v633_v42  ;;  %v597_v11 = vmul.f32 %v818_v36, %v1095_v27  ;;  %v541_v54 = vadd.f32 1e-06, %v509_v20  ;;  %v542_v8 = vadd.f32 1e-06, %v510_v46 }
 0x146   : > { %v672_v58 = vadd.f32 %v1282_v18, %v634_v50  ;;  %v598_v24 = vmul.f32 %v820_v26, %v1104_v2  ;;  %v443_v62 = vpop.xlane.xlu1 %442  ;;  %v446_v40 = vpop.xlane.xlu0 %445 }
 0x147   : > { %703 = vst.msk [vmem:[%s1290_s25 + $0x8] sm:$0xff] %vm208_vm0, %v671_v52  ;;  %v635_v3 = vmul.f32 %v1276_v6, %v597_v11  ;;  %833 = vrsqrt.f32 %v541_v54  ;;  %v511_v56 = vmul.f32 0.03125, %v443_v62  ;;  %v512_v12 = vmul.f32 0.03125, %v446_v40 }
 0x148   : > { %v822_v14 = vpop.eup %821  ;;  %704 = vst.msk [vmem:[%s1290_s25 + $0x10] sm:$0xff] %vm208_vm0, %v672_v58  ;;  %v636_v27 = vmul.f32 %v1276_v6, %v598_v24  ;;  %835 = vrsqrt.f32 %v542_v8 }
 0x149   : > { %v824_v28 = vpop.eup %823  ;;  %v673_v2 = vadd.f32 %v1282_v18, %v635_v3  ;;  %v599_v60 = vmul.f32 %v822_v14, %v1107_v5  ;;  %v543_v61 = vadd.f32 1e-06, %v511_v56  ;;  %v544_v44 = vadd.f32 1e-06, %v512_v12 }
 0x14a   : > { %v674_v22 = vadd.f32 %v1282_v18, %v636_v27  ;;  %v600_v23 = vmul.f32 %v824_v28, %v1116_v55  ;;  %v449_v0 = vpop.xlane.xlu1 %448  ;;  %v452_v10 = vpop.xlane.xlu0 %451 }
 0x14b   : > { %705 = vst.msk [vmem:[%s1290_s25 + $0x18] sm:$0xff] %vm208_vm0, %v673_v2  ;;  %v637_v16 = vmul.f32 %v1276_v6, %v599_v60  ;;  %837 = vrsqrt.f32 %v543_v61  ;;  %v513_v30 = vmul.f32 0.03125, %v449_v0  ;;  %v514_v32 = vmul.f32 0.03125, %v452_v10 }
 0x14c   : > { %v826_v34 = vpop.eup %825  ;;  %706 = vst.msk [vmem:[%s1290_s25 + $0x20] sm:$0xff] %vm208_vm0, %v674_v22  ;;  %v638_v5 = vmul.f32 %v1276_v6, %v600_v23  ;;  %839 = vrsqrt.f32 %v544_v44 }
 0x14d   : > { %v828_v48 = vpop.eup %827  ;;  %v675_v55 = vadd.f32 %v1282_v18, %v637_v16  ;;  %v601_v38 = vmul.f32 %v826_v34, %v1119_v9  ;;  %v545_v39 = vadd.f32 1e-06, %v513_v30  ;;  %v546_v42 = vadd.f32 1e-06, %v514_v32 }
 0x14e   : > { %v676_v20 = vadd.f32 %v1282_v18, %v638_v5  ;;  %v602_v46 = vmul.f32 %v828_v48, %v1128_v7  ;;  %v455_v36 = vpop.xlane.xlu1 %454  ;;  %v458_v50 = vpop.xlane.xlu0 %457 }
 0x14f   : > { %707 = vst.msk [vmem:[%s1290_s25 + $0x28] sm:$0xff] %vm208_vm0, %v675_v55  ;;  %v639_v26 = vmul.f32 %v1276_v6, %v601_v38  ;;  %841 = vrsqrt.f32 %v545_v39  ;;  %v515_v52 = vmul.f32 0.03125, %v455_v36  ;;  %v516_v11 = vmul.f32 0.03125, %v458_v50 }
 0x150   : > { %v830_v54 = vpop.eup %829  ;;  %708 = vst.msk [vmem:[%s1290_s25 + $0x30] sm:$0xff] %vm208_vm0, %v676_v20  ;;  %v640_v9 = vmul.f32 %v1276_v6, %v602_v46  ;;  %843 = vrsqrt.f32 %v546_v42 }
 0x151   : > { %v832_v8 = vpop.eup %831  ;;  %v677_v7 = vadd.f32 %v1282_v18, %v639_v26  ;;  %v603_v58 = vmul.f32 %v830_v54, %v1131_v13  ;;  %v547_v24 = vadd.f32 1e-06, %v515_v52  ;;  %v548_v62 = vadd.f32 1e-06, %v516_v11 }
 0x152   : > { %v678_v40 = vadd.f32 %v1282_v18, %v640_v9  ;;  %v604_v3 = vmul.f32 %v832_v8, %v1140_v1  ;;  %v461_v56 = vpop.xlane.xlu1 %460  ;;  %v464_v12 = vpop.xlane.xlu0 %463 }
 0x153   : > { %709 = vst.msk [vmem:[%s1290_s25 + $0x38] sm:$0xff] %vm208_vm0, %v677_v7  ;;  %v641_v14 = vmul.f32 %v1276_v6, %v603_v58  ;;  %845 = vrsqrt.f32 %v547_v24  ;;  %v517_v27 = vmul.f32 0.03125, %v461_v56  ;;  %v518_v28 = vmul.f32 0.03125, %v464_v12 }
 0x154   : > { %v834_v2 = vpop.eup %833  ;;  %710 = vst.msk [vmem:[%s1290_s25 + $0x40] sm:$0xff] %vm208_vm0, %v678_v40  ;;  %v642_v13 = vmul.f32 %v1276_v6, %v604_v3  ;;  %847 = vrsqrt.f32 %v548_v62 }
 0x155   : > { %v836_v60 = vpop.eup %835  ;;  %v679_v1 = vadd.f32 %v1282_v18, %v641_v14  ;;  %v605_v61 = vmul.f32 %v834_v2, %v1143_v17  ;;  %v549_v44 = vadd.f32 1e-06, %v517_v27  ;;  %v550_v22 = vadd.f32 1e-06, %v518_v28 }
 0x156   : > { %v680_v23 = vadd.f32 %v1282_v18, %v642_v13  ;;  %v606_v0 = vmul.f32 %v836_v60, %v1152_v43  ;;  %v467_v10 = vpop.xlane.xlu1 %466  ;;  %v470_v16 = vpop.xlane.xlu0 %469 }
 0x157   : > { %711 = vst.msk [vmem:[%s1290_s25 + $0x48] sm:$0xff] %vm208_vm0, %v679_v1  ;;  %v643_v30 = vmul.f32 %v1276_v6, %v605_v61  ;;  %849 = vrsqrt.f32 %v549_v44  ;;  %v519_v32 = vmul.f32 0.03125, %v467_v10  ;;  %v520_v34 = vmul.f32 0.03125, %v470_v16 }
 0x158   : > { %v838_v5 = vpop.eup %837  ;;  %712 = vst.msk [vmem:[%s1290_s25 + $0x50] sm:$0xff] %vm208_vm0, %v680_v23  ;;  %v644_v17 = vmul.f32 %v1276_v6, %v606_v0  ;;  %851 = vrsqrt.f32 %v550_v22 }
 0x159   : > { %v840_v48 = vpop.eup %839  ;;  %v681_v43 = vadd.f32 %v1282_v18, %v643_v30  ;;  %v607_v55 = vmul.f32 %v838_v5, %v1155_v21  ;;  %v551_v38 = vadd.f32 1e-06, %v519_v32  ;;  %v552_v39 = vadd.f32 1e-06, %v520_v34 }
 0x15a   : > { %v682_v42 = vadd.f32 %v1282_v18, %v644_v17  ;;  %v608_v20 = vmul.f32 %v840_v48, %v1164_v59  ;;  %v473_v46 = vpop.xlane.xlu1 %472  ;;  %v476_v36 = vpop.xlane.xlu0 %475 }
 0x15b   : > { %713 = vst.msk [vmem:[%s1290_s25 + $0x58] sm:$0xff] %vm208_vm0, %v681_v43  ;;  %v645_v50 = vmul.f32 %v1276_v6, %v607_v55  ;;  %853 = vrsqrt.f32 %v551_v38  ;;  %v521_v26 = vmul.f32 0.03125, %v473_v46  ;;  %v522_v52 = vmul.f32 0.03125, %v476_v36 }
 0x15c   : > { %v842_v11 = vpop.eup %841  ;;  %714 = vst.msk [vmem:[%s1290_s25 + $0x60] sm:$0xff] %vm208_vm0, %v682_v42  ;;  %v646_v21 = vmul.f32 %v1276_v6, %v608_v20  ;;  %855 = vrsqrt.f32 %v552_v39 }
 0x15d   : > { %v844_v54 = vpop.eup %843  ;;  %v683_v59 = vadd.f32 %v1282_v18, %v645_v50  ;;  %v609_v9 = vmul.f32 %v842_v11, %v1167_v25  ;;  %v553_v8 = vadd.f32 1e-06, %v521_v26  ;;  %v554_v7 = vadd.f32 1e-06, %v522_v52 }
 0x15e   : > { %v684_v58 = vadd.f32 %v1282_v18, %v646_v21  ;;  %v610_v24 = vmul.f32 %v844_v54, %v1176_v15  ;;  %v479_v62 = vpop.xlane.xlu1 %478  ;;  %v482_v40 = vpop.xlane.xlu0 %481 }
 0x15f   : > { %715 = vst.msk [vmem:[%s1290_s25 + $0x68] sm:$0xff] %vm208_vm0, %v683_v59  ;;  %v647_v3 = vmul.f32 %v1276_v6, %v609_v9  ;;  %857 = vrsqrt.f32 %v553_v8  ;;  %v523_v56 = vmul.f32 0.03125, %v479_v62  ;;  %v524_v12 = vmul.f32 0.03125, %v482_v40 }
 0x160   : > { %v846_v14 = vpop.eup %845  ;;  %716 = vst.msk [vmem:[%s1290_s25 + $0x70] sm:$0xff] %vm208_vm0, %v684_v58  ;;  %v648_v25 = vmul.f32 %v1276_v6, %v610_v24  ;;  %859 = vrsqrt.f32 %v554_v7 }
 0x161   : > { %v848_v27 = vpop.eup %847  ;;  %v685_v15 = vadd.f32 %v1282_v18, %v647_v3  ;;  %v611_v28 = vmul.f32 %v846_v14, %v1179_v29  ;;  %v555_v2 = vadd.f32 1e-06, %v523_v56  ;;  %v556_v13 = vadd.f32 1e-06, %v524_v12 }
 0x162   : > { %v686_v60 = vadd.f32 %v1282_v18, %v648_v25  ;;  %v612_v1 = vmul.f32 %v848_v27, %v1188_v31  ;;  %v485_v61 = vpop.xlane.xlu1 %484  ;;  %v488_v44 = vpop.xlane.xlu0 %487 }
 0x163   : > { %717 = vst.msk [vmem:[%s1290_s25 + $0x78] sm:$0xff] %vm208_vm0, %v685_v15  ;;  %v649_v22 = vmul.f32 %v1276_v6, %v611_v28  ;;  %861 = vrsqrt.f32 %v555_v2  ;;  %v525_v23 = vmul.f32 0.03125, %v485_v61  ;;  %v526_v0 = vmul.f32 0.03125, %v488_v44 }
 0x164   : > { %v850_v10 = vpop.eup %849  ;;  %718 = vst.msk [vmem:[%s1290_s25 + $0x80] sm:$0xff] %vm208_vm0, %v686_v60  ;;  %v650_v29 = vmul.f32 %v1276_v6, %v612_v1  ;;  %863 = vrsqrt.f32 %v556_v13 }
 0x165   : > { %v852_v16 = vpop.eup %851  ;;  %v687_v31 = vadd.f32 %v1282_v18, %v649_v22  ;;  %v613_v30 = vmul.f32 %v850_v10, %v1191_v33  ;;  %v557_v32 = vadd.f32 1e-06, %v525_v23  ;;  %v558_v34 = vadd.f32 1e-06, %v526_v0 }
 0x166   : > { %v688_v5 = vadd.f32 %v1282_v18, %v650_v29  ;;  %v614_v17 = vmul.f32 %v852_v16, %v1200_v47  ;;  %v491_v48 = vpop.xlane.xlu1 %490  ;;  %v494_v43 = vpop.xlane.xlu0 %493 }
 0x167   : > { %719 = vst.msk [vmem:[%s1290_s25 + $0x88] sm:$0xff] %vm208_vm0, %v687_v31  ;;  %v651_v55 = vmul.f32 %v1276_v6, %v613_v30  ;;  %865 = vrsqrt.f32 %v557_v32  ;;  %v527_v38 = vmul.f32 0.03125, %v491_v48  ;;  %v528_v39 = vmul.f32 0.03125, %v494_v43 }
 0x168   : > { %v854_v42 = vpop.eup %853  ;;  %720 = vst.msk [vmem:[%s1290_s25 + $0x90] sm:$0xff] %vm208_vm0, %v688_v5  ;;  %v652_v33 = vmul.f32 %v1276_v6, %v614_v17  ;;  %867 = vrsqrt.f32 %v558_v34 }
 0x169   : > { %v856_v20 = vpop.eup %855  ;;  %v689_v47 = vadd.f32 %v1282_v18, %v651_v55  ;;  %v615_v46 = vmul.f32 %v854_v42, %v1203_v37  ;;  %v559_v36 = vadd.f32 1e-06, %v527_v38  ;;  %v560_v50 = vadd.f32 1e-06, %v528_v39 }
 0x16a   : > { %v690_v26 = vadd.f32 %v1282_v18, %v652_v33  ;;  %v616_v52 = vmul.f32 %v856_v20, %v1212_v63  ;;  %v497_v11 = vpop.xlane.xlu1 %496 }
 0x16b   : > { %721 = vst.msk [vmem:[%s1290_s25 + $0x98] sm:$0xff] %vm208_vm0, %v689_v47  ;;  %v653_v21 = vmul.f32 %v1276_v6, %v615_v46  ;;  %869 = vrsqrt.f32 %v559_v36  ;;  %v529_v54 = vmul.f32 0.03125, %v497_v11 }
 0x16c   : > { %v858_v59 = vpop.eup %857  ;;  %722 = vst.msk [vmem:[%s1290_s25 + $0xa0] sm:$0xff] %vm208_vm0, %v690_v26  ;;  %v654_v37 = vmul.f32 %v1276_v6, %v616_v52  ;;  %871 = vrsqrt.f32 %v560_v50 }
 0x16d   : > { %v860_v9 = vpop.eup %859  ;;  %v691_v8 = vadd.f32 %v1282_v18, %v653_v21  ;;  %v617_v63 = vmul.f32 %v858_v59, %v1215_v41  ;;  %v561_v7 = vadd.f32 1e-06, %v529_v54 }
 0x16e   : > { %v692_v58 = vadd.f32 %v1282_v18, %v654_v37  ;;  %v618_v24 = vmul.f32 %v860_v9, %v1224_v19 }
 0x16f   : > { %723 = vst.msk [vmem:[%s1290_s25 + $0xa8] sm:$0xff] %vm208_vm0, %v691_v8  ;;  %v655_v62 = vmul.f32 %v1276_v6, %v617_v63  ;;  %873 = vrsqrt.f32 %v561_v7 }
 0x170   : > { %v862_v40 = vpop.eup %861  ;;  %724 = vst.msk [vmem:[%s1290_s25 + $0xb0] sm:$0xff] %vm208_vm0, %v692_v58  ;;  %v656_v3 = vmul.f32 %v1276_v6, %v618_v24 }
 0x171   : > { %v864_v56 = vpop.eup %863  ;;  %v693_v41 = vadd.f32 %v1282_v18, %v655_v62  ;;  %v619_v12 = vmul.f32 %v862_v40, %v1227_v45 }
 0x172   : > { %v694_v14 = vadd.f32 %v1282_v18, %v656_v3  ;;  %v620_v19 = vmul.f32 %v864_v56, %v1236_v35 }
 0x173   : > { %725 = vst.msk [vmem:[%s1290_s25 + $0xb8] sm:$0xff] %vm208_vm0, %v693_v41  ;;  %v657_v25 = vmul.f32 %v1276_v6, %v619_v12 }
 0x174   : > { %v866_v27 = vpop.eup %865  ;;  %726 = vst.msk [vmem:[%s1290_s25 + $0xc0] sm:$0xff] %vm208_vm0, %v694_v14  ;;  %v658_v15 = vmul.f32 %v1276_v6, %v620_v19 }
 0x175   : > { %v868_v28 = vpop.eup %867  ;;  %v695_v2 = vadd.f32 %v1282_v18, %v657_v25  ;;  %v621_v45 = vmul.f32 %v866_v27, %v1239_v49 }
 0x176   : > { %v696_v13 = vadd.f32 %v1282_v18, %v658_v15  ;;  %v622_v35 = vmul.f32 %v868_v28, %v1248_v51 }
 0x177   : > { %727 = vst.msk [vmem:[%s1290_s25 + $0xc8] sm:$0xff] %vm208_vm0, %v695_v2  ;;  %v659_v60 = vmul.f32 %v1276_v6, %v621_v45 }
 0x178   : > { %v870_v1 = vpop.eup %869  ;;  %728 = vst.msk [vmem:[%s1290_s25 + $0xd0] sm:$0xff] %vm208_vm0, %v696_v13  ;;  %v660_v61 = vmul.f32 %v1276_v6, %v622_v35 }
 0x179   : > { %v872_v44 = vpop.eup %871  ;;  %v697_v22 = vadd.f32 %v1282_v18, %v659_v60  ;;  %v623_v49 = vmul.f32 %v870_v1, %v1251_v53 }
 0x17a   : > { %v698_v23 = vadd.f32 %v1282_v18, %v660_v61  ;;  %v624_v51 = vmul.f32 %v872_v44, %v1260_v4 }
 0x17b   : > { %729 = vst.msk [vmem:[%s1290_s25 + $0xd8] sm:$0xff] %vm208_vm0, %v697_v22  ;;  %v661_v0 = vmul.f32 %v1276_v6, %v623_v49 }
 0x17c   : > { %v874_v10 = vpop.eup %873  ;;  %730 = vst.msk [vmem:[%s1290_s25 + $0xe0] sm:$0xff] %vm208_vm0, %v698_v23  ;;  %v662_v29 = vmul.f32 %v1276_v6, %v624_v51 }
 0x17d   : > { %v699_v16 = vadd.f32 %v1282_v18, %v661_v0  ;;  %v625_v31 = vmul.f32 %v874_v10, %v1263_v57 }
 0x17e   : > { %v700_v30 = vadd.f32 %v1282_v18, %v662_v29 }
 0x17f   : > { %731 = vst.msk [vmem:[%s1290_s25 + $0xe8] sm:$0xff] %vm208_vm0, %v699_v16  ;;  %v663_v53 = vmul.f32 %v1276_v6, %v625_v31 }
 0x180   : > { %732 = vst.msk [vmem:[%s1290_s25 + $0xf0] sm:$0xff] %vm208_vm0, %v700_v30 }
 0x181   : > { %v701_v4 = vadd.f32 %v1282_v18, %v663_v53 }
 0x183   : > { %733 = vst.msk [vmem:[%s1290_s25 + $0xf8] sm:$0xff] %vm208_vm0, %v701_v4 }
 0x184 PF: > { %s13_s12 = sadd.s32 1, %s881_s12  }
 0x185   : > { %p10_p4 = scmp.ge.s32.totalorder %s13_s12, 4  }
 0x187   :  { %12 = sbr.rel (!%p10_p4) target bundleno = 1 (0x1), region = 62 }

</bundles_post_ra>
